<compile_context>
chip_gen: v5e
topology: v5e:2x2
jax: 0.10.0
libtpu: 0.0.40
codegen_flags: <defaults>
</compile_context>

<pallas_src>
import numpy as np

import jax
import jax.numpy as jnp
from jax import lax
from jax.experimental import pallas as pl
from jax.experimental.pallas import tpu as pltpu

EPS = 1e-5                   # PyTorch BatchNorm3d default eps
MATMUL_DTYPE = jnp.float32   # jnp.bfloat16 recommended on v6e/v7x (re-validate tol)


# ----------------------------------------------------------------------------
# Fused 3x3x3 conv + folded BN + ReLU (+ residual) kernel
# ----------------------------------------------------------------------------
def _make_conv_kernel(Wp, C, S, q0, L, with_residual):
    """Kernel computing one output depth slice.

    Refs (in order):
      x_ref: (1, Dp, C, S)  whole zero-padded volume of batch `n` (resident)
      w_ref: (9, C, 3C)     kd-merged weights, BN scale folded in
      b_ref: (C, 1)         folded bias (per output channel)
      m_ref: (1, L)         interior mask over the computed lane span
      r_ref: (1, 1, C, S)   residual slice (only when with_residual)
      o_ref: (1, 1, C, S)   output slice (same padded layout, zero borders)
    """

    def kernel(*refs):
        if with_residual:
            x_ref, w_ref, b_ref, m_ref, r_ref, o_ref = refs
        else:
            x_ref, w_ref, b_ref, m_ref, o_ref = refs

        d = pl.program_id(1)
        n_d = pl.num_programs(1)
        is_border = jnp.logical_or(d == 0, d == n_d - 1)

        @pl.when(is_border)
        def _():
            # depth-padding slices of the output stay zero (keeps the carried
            # activation properly zero-padded for the next conv).
            o_ref[...] = jnp.zeros_like(o_ref)

        @pl.when(jnp.logical_not(is_border))
        def _():
            # Three neighbouring depth slices merged along the contraction axis.
            # C sits on the sublane axis, so this reshape is tile-preserving.
            xslab = x_ref[0, pl.ds(d - 1, 3), :, :].reshape(3 * C, S)
            w_all = w_ref[...]
            if MATMUL_DTYPE != jnp.float32:
                xslab = xslab.astype(MATMUL_DTYPE)
                w_all = w_all.astype(MATMUL_DTYPE)

            # 9 matmuls (kh, kw) with K = 3C; lane-offset slices give the
            # spatial shifts of the flattened padded H*W plane.
            acc = jnp.zeros((C, L), jnp.float32)
            for kh in range(3):
                for kw in range(3):
                    off = (kh - 1) * Wp + (kw - 1)
                    xs = xslab[:, q0 + off:q0 + off + L]
                    acc = acc + jnp.dot(w_all[kh * 3 + kw], xs,
                                        preferred_element_type=jnp.float32)

            # folded BN bias + ReLU, then zero out non-interior positions.
            y = jnp.maximum(acc + b_ref[...], 0.0) * m_ref[...]
            if with_residual:
                y = y + r_ref[0, 0, :, pl.ds(q0, L)].astype(jnp.float32)

            # single full-width, lane-dense store of the padded slice.
            left = jnp.zeros((C, q0), o_ref.dtype)
            right = jnp.zeros((C, S - q0 - L), o_ref.dtype)
            o_ref[0, 0] = jnp.concatenate(
                [left, y.astype(o_ref.dtype), right], axis=1)

    return kernel


def _conv_bn_relu(x_flat, w_m, bias, mask, residual, *, Wp, q0, L):
    N, Dp, C, S = x_flat.shape
    kernel = _make_conv_kernel(Wp, C, S, q0, L, residual is not None)

    in_specs = [
        pl.BlockSpec((1, Dp, C, S), lambda n, d: (n, 0, 0, 0)),   # resident volume
        pl.BlockSpec((9, C, 3 * C), lambda n, d: (0, 0, 0)),      # merged weights
        pl.BlockSpec((C, 1), lambda n, d: (0, 0)),                # folded bias
        pl.BlockSpec((1, L), lambda n, d: (0, 0)),                # interior mask
    ]
    args = [x_flat, w_m, bias, mask]
    if residual is not None:
        in_specs.append(pl.BlockSpec((1, 1, C, S), lambda n, d: (n, d, 0, 0)))
        args.append(residual)

    return pl.pallas_call(
        kernel,
        out_shape=jax.ShapeDtypeStruct((N, Dp, C, S), jnp.float32),
        grid_spec=pltpu.PrefetchScalarGridSpec(
            num_scalar_prefetch=0,
            grid=(N, Dp),
            in_specs=in_specs,
            out_specs=pl.BlockSpec((1, 1, C, S), lambda n, d: (n, d, 0, 0))),
        compiler_params=pltpu.CompilerParams(
            dimension_semantics=("parallel", "parallel"),
            vmem_limit_bytes=48 * 1024 * 1024),
    )(*args)


# ----------------------------------------------------------------------------
# Forward pass (glue: one pack at the start, one unpack at the end)
# ----------------------------------------------------------------------------
@jax.jit
def bridge_forward(x_ncdhw, layer_params):
    N, C, D, H, W = x_ncdhw.shape
    Dp, Hp, Wp = D + 2, H + 2, W + 2
    Sp = Hp * Wp
    S = ((Sp + 127) // 128) * 128      # lane-dense storage width
    q0 = Wp + 1                        # first computed flat coordinate
    L = Sp - 2 * q0                    # computed span (covers all interior)

    # interior mask over the computed lane span (trace-time constant)
    q = np.arange(q0, q0 + L)
    hh, ww = q // Wp, q % Wp
    m = (hh >= 1) & (hh <= H) & (ww >= 1) & (ww <= W)
    mask = jnp.asarray(m.astype(np.float32).reshape(1, L))

    # pack once: channels -> sublanes, flattened zero-padded H*W plane -> lanes
    xt = jnp.transpose(x_ncdhw, (0, 2, 1, 3, 4))                  # (N, D, C, H, W)
    xp = jnp.pad(xt, ((0, 0), (1, 1), (0, 0), (1, 1), (1, 1)))    # (N, Dp, C, Hp, Wp)
    h = jnp.pad(xp.reshape(N, Dp, C, Sp),
                ((0, 0), (0, 0), (0, 0), (0, S - Sp)))            # (N, Dp, C, S)

    for lp in layer_params:
        h1 = _conv_bn_relu(h, lp["w1m"], lp["b1f"], mask, None,
                           Wp=Wp, q0=q0, L=L)
        h = _conv_bn_relu(h1, lp["w2m"], lp["b2f"], mask, h,       # fused +x
                          Wp=Wp, q0=q0, L=L)

    # unpack interior, back to NCDHW
    out = h[:, 1:D + 1, :, :Sp].reshape(N, D, C, Hp, Wp)[:, :, :, 1:H + 1, 1:W + 1]
    return jnp.transpose(out, (0, 2, 1, 3, 4))


# ----------------------------------------------------------------------------
# Deterministic parameter initialization + BN folding
# ----------------------------------------------------------------------------
def init_raw_params(key, channels, layers):
    def conv_init(k):
        kw_, kb_ = jax.random.split(k)
        w = 0.1 * jax.random.normal(kw_, (channels, channels, 3, 3, 3), jnp.float32)
        b = 0.05 * jax.random.normal(kb_, (channels,), jnp.float32)
        return w, b

    def bn_init(k):
        k1, k2, k3, k4 = jax.random.split(k, 4)
        return dict(
            gamma=1.0 + 0.1 * jax.random.normal(k1, (channels,), jnp.float32),
            beta=0.1 * jax.random.normal(k2, (channels,), jnp.float32),
            mean=0.1 * jax.random.normal(k3, (channels,), jnp.float32),
            var=jax.random.uniform(k4, (channels,), jnp.float32,
                                   minval=0.5, maxval=1.5))

    raws = []
    for lk in jax.random.split(key, layers):
        ks = jax.random.split(lk, 4)
        w1, b1 = conv_init(ks[0])
        w2, b2 = conv_init(ks[2])
        raws.append(dict(w1=w1, b1=b1, bn1=bn_init(ks[1]),
                         w2=w2, b2=b2, bn2=bn_init(ks[3])))
    return raws


def fold_params(raw_layers):
    """Fold BN into conv weights/bias and merge the kd taps into K=3C."""
    def fold(w, b, bn):
        c = w.shape[0]
        s = bn["gamma"] / jnp.sqrt(bn["var"] + EPS)
        wf = w * s[:, None, None, None, None]
        bf = s * (b - bn["mean"]) + bn["beta"]
        # (O, I, Kd, Kh, Kw) -> (Kh, Kw, O, Kd, I) -> (9, O, 3*I)
        wm = jnp.transpose(wf, (3, 4, 0, 2, 1)).reshape(9, c, 3 * c)
        return wm, bf.reshape(c, 1)

    folded = []
    for r in raw_layers:
        w1m, b1f = fold(r["w1"], r["b1"], r["bn1"])
        w2m, b2f = fold(r["w2"], r["b2"], r["bn2"])
        folded.append(dict(w1m=w1m, b1f=b1f, w2m=w2m, b2f=b2f))
    return folded


# ----------------------------------------------------------------------------
# Pure-JAX reference (eval-mode PyTorch semantics)
# ----------------------------------------------------------------------------
def _conv_bn_relu_ref(x, w, b, bn):
    y = lax.conv_general_dilated(
        x, w, window_strides=(1, 1, 1), padding=[(1, 1)] * 3,
        dimension_numbers=("NCDHW", "OIDHW", "NCDHW"))
    y = y + b[None, :, None, None, None]
    s = bn["gamma"] / jnp.sqrt(bn["var"] + EPS)
    t = bn["beta"] - bn["mean"] * s
    return jnp.maximum(y * s[None, :, None, None, None]
                       + t[None, :, None, None, None], 0.0)


def reference_forward(x, raw_layers):
    for r in raw_layers:
        h = _conv_bn_relu_ref(x, r["w1"], r["b1"], r["bn1"])
        h = _conv_bn_relu_ref(h, r["w2"], r["b2"], r["bn2"])
        x = h + x
    return x


# ----------------------------------------------------------------------------
if __name__ == "__main__":
    key = jax.random.PRNGKey(0)
    kx, kp = jax.random.split(key)

    N, C, D, H, W = 2, 8, 8, 8, 8
    LAYERS = 2

    x = jax.random.normal(kx, (N, C, D, H, W), jnp.float32)
    raw = init_raw_params(kp, C, LAYERS)
    params = fold_params(raw)

    out = jax.block_until_ready(bridge_forward(x, params))
    assert out.shape == (N, C, D, H, W), out.shape

    ref = reference_forward(x, raw)
    max_err = float(jnp.max(jnp.abs(out - ref)))
    assert max_err < 1e-3, f"max abs err {max_err}"

    print("KERNEL_OK")
</pallas_src>

<mosaic_0001>
module attributes {stable_mosaic.version = 11 : i64} {
  func.func @kernel(%arg0: i32, %arg1: i32, %arg2: memref<1x10x8x128xf32, #tpu.memory_space<vmem>>, %arg3: memref<9x8x24xf32, #tpu.memory_space<vmem>>, %arg4: memref<8x1xf32, #tpu.memory_space<vmem>>, %arg5: memref<1x78xf32, #tpu.memory_space<vmem>>, %arg6: memref<1x1x8x128xf32, #tpu.memory_space<vmem>>) attributes {dimension_semantics = [#tpu.dimension_semantics<parallel>, #tpu.dimension_semantics<parallel>], iteration_bounds = array<i64: 2, 10>, scalar_prefetch = 0 : i64, scratch_operands = 0 : i64, tpu.core_type = #tpu.core_type<tc>, window_params = [{transform_indices = @transform_0, window_bounds = array<i64: 1, 10, 8, 128>}, {pipeline_mode = #tpu.pipeline_mode<synchronous>, transform_indices = @transform_1, window_bounds = array<i64: 9, 8, 24>}, {pipeline_mode = #tpu.pipeline_mode<synchronous>, transform_indices = @transform_2, window_bounds = array<i64: 8, 1>}, {pipeline_mode = #tpu.pipeline_mode<synchronous>, transform_indices = @transform_3, window_bounds = array<i64: 1, 78>}, {transform_indices = @transform_4, window_bounds = array<i64: 1, 1, 8, 128>}]} {
    %c0_i32 = arith.constant 0 : i32
    %0 = arith.cmpi eq, %arg1, %c0_i32 : i32
    %c9_i32 = arith.constant 9 : i32
    %1 = arith.cmpi eq, %arg1, %c9_i32 : i32
    %2 = arith.ori %0, %1 : i1
    %3 = arith.extui %2 : i1 to i32
    %c0_i32_0 = arith.constant 0 : i32
    %4 = arith.cmpi ne, %3, %c0_i32_0 : i32
    scf.if %4 {
      %cst = arith.constant 0.000000e+00 : f32
      %8 = vector.broadcast %cst : f32 to vector<1x1x8x128xf32>
      %c0 = arith.constant 0 : index
      %c0_2 = arith.constant 0 : index
      %c0_3 = arith.constant 0 : index
      %c0_4 = arith.constant 0 : index
      %9 = vector.load %arg6[%c0, %c0_2, %c0_3, %c0_4] : memref<1x1x8x128xf32, #tpu.memory_space<vmem>>, vector<1x1x8x128xf32>
      tpu.vector_store %arg6[%c0, %c0_2, %c0_3, %c0_4], %8 {strides = array<i32>} : memref<1x1x8x128xf32, #tpu.memory_space<vmem>>, vector<1x1x8x128xf32>,
    } else {
    }
    %true = arith.constant true
    %5 = arith.xori %2, %true : i1
    %6 = arith.extui %5 : i1 to i32
    %c0_i32_1 = arith.constant 0 : i32
    %7 = arith.cmpi ne, %6, %c0_i32_1 : i32
    scf.if %7 {
      %c1_i32 = arith.constant 1 : i32
      %8 = arith.subi %arg1, %c1_i32 : i32
      %c0 = arith.constant 0 : index
      %9 = arith.index_cast %8 : i32 to index
      %c0_2 = arith.constant 0 : index
      %c0_3 = arith.constant 0 : index
      %10 = vector.load %arg2[%c0, %9, %c0_2, %c0_3] : memref<1x10x8x128xf32, #tpu.memory_space<vmem>>, vector<1x3x8x128xf32>
      %11 = vector.shape_cast %10 : vector<1x3x8x128xf32> to vector<3x8x128xf32>
      %12 = vector.shape_cast %11 : vector<3x8x128xf32> to vector<24x128xf32>
      %c0_4 = arith.constant 0 : index
      %c0_5 = arith.constant 0 : index
      %c0_6 = arith.constant 0 : index
      %13 = vector.load %arg3[%c0_4, %c0_5, %c0_6] : memref<9x8x24xf32, #tpu.memory_space<vmem>>, vector<9x8x24xf32>
      %cst = arith.constant 0.000000e+00 : f32
      %14 = vector.broadcast %cst : f32 to vector<8x78xf32>
      %15 = vector.extract_strided_slice %12 {offsets = [0, 0], sizes = [24, 78], strides = [1, 1]} : vector<24x128xf32> to vector<24x78xf32>
      %16 = vector.extract_strided_slice %13 {offsets = [0, 0, 0], sizes = [1, 8, 24], strides = [1, 1, 1]} : vector<9x8x24xf32> to vector<1x8x24xf32>
      %17 = vector.shape_cast %16 : vector<1x8x24xf32> to vector<8x24xf32>
      %cst_7 = arith.constant dense<0.000000e+00> : vector<8x78xf32>
      %18 = tpu.matmul %17, %15, %cst_7 {dimension_numbers = #tpu.dot_dimension_numbers<[1], [0], [0], [1], [0, 0, 1, 1], [], []>} : vector<8x24xf32>, vector<24x78xf32>, vector<8x78xf32> -> vector<8x78xf32>
      %19 = arith.addf %14, %18 : vector<8x78xf32>
      %20 = vector.extract_strided_slice %12 {offsets = [0, 1], sizes = [24, 78], strides = [1, 1]} : vector<24x128xf32> to vector<24x78xf32>
      %21 = vector.extract_strided_slice %13 {offsets = [1, 0, 0], sizes = [1, 8, 24], strides = [1, 1, 1]} : vector<9x8x24xf32> to vector<1x8x24xf32>
      %22 = vector.shape_cast %21 : vector<1x8x24xf32> to vector<8x24xf32>
      %cst_8 = arith.constant dense<0.000000e+00> : vector<8x78xf32>
      %23 = tpu.matmul %22, %20, %cst_8 {dimension_numbers = #tpu.dot_dimension_numbers<[1], [0], [0], [1], [0, 0, 1, 1], [], []>} : vector<8x24xf32>, vector<24x78xf32>, vector<8x78xf32> -> vector<8x78xf32>
      %24 = arith.addf %19, %23 : vector<8x78xf32>
      %25 = vector.extract_strided_slice %12 {offsets = [0, 2], sizes = [24, 78], strides = [1, 1]} : vector<24x128xf32> to vector<24x78xf32>
      %26 = vector.extract_strided_slice %13 {offsets = [2, 0, 0], sizes = [1, 8, 24], strides = [1, 1, 1]} : vector<9x8x24xf32> to vector<1x8x24xf32>
      %27 = vector.shape_cast %26 : vector<1x8x24xf32> to vector<8x24xf32>
      %cst_9 = arith.constant dense<0.000000e+00> : vector<8x78xf32>
      %28 = tpu.matmul %27, %25, %cst_9 {dimension_numbers = #tpu.dot_dimension_numbers<[1], [0], [0], [1], [0, 0, 1, 1], [], []>} : vector<8x24xf32>, vector<24x78xf32>, vector<8x78xf32> -> vector<8x78xf32>
      %29 = arith.addf %24, %28 : vector<8x78xf32>
      %30 = vector.extract_strided_slice %12 {offsets = [0, 10], sizes = [24, 78], strides = [1, 1]} : vector<24x128xf32> to vector<24x78xf32>
      %31 = vector.extract_strided_slice %13 {offsets = [3, 0, 0], sizes = [1, 8, 24], strides = [1, 1, 1]} : vector<9x8x24xf32> to vector<1x8x24xf32>
      %32 = vector.shape_cast %31 : vector<1x8x24xf32> to vector<8x24xf32>
      %cst_10 = arith.constant dense<0.000000e+00> : vector<8x78xf32>
      %33 = tpu.matmul %32, %30, %cst_10 {dimension_numbers = #tpu.dot_dimension_numbers<[1], [0], [0], [1], [0, 0, 1, 1], [], []>} : vector<8x24xf32>, vector<24x78xf32>, vector<8x78xf32> -> vector<8x78xf32>
      %34 = arith.addf %29, %33 : vector<8x78xf32>
      %35 = vector.extract_strided_slice %12 {offsets = [0, 11], sizes = [24, 78], strides = [1, 1]} : vector<24x128xf32> to vector<24x78xf32>
      %36 = vector.extract_strided_slice %13 {offsets = [4, 0, 0], sizes = [1, 8, 24], strides = [1, 1, 1]} : vector<9x8x24xf32> to vector<1x8x24xf32>
      %37 = vector.shape_cast %36 : vector<1x8x24xf32> to vector<8x24xf32>
      %cst_11 = arith.constant dense<0.000000e+00> : vector<8x78xf32>
      %38 = tpu.matmul %37, %35, %cst_11 {dimension_numbers = #tpu.dot_dimension_numbers<[1], [0], [0], [1], [0, 0, 1, 1], [], []>} : vector<8x24xf32>, vector<24x78xf32>, vector<8x78xf32> -> vector<8x78xf32>
      %39 = arith.addf %34, %38 : vector<8x78xf32>
      %40 = vector.extract_strided_slice %12 {offsets = [0, 12], sizes = [24, 78], strides = [1, 1]} : vector<24x128xf32> to vector<24x78xf32>
      %41 = vector.extract_strided_slice %13 {offsets = [5, 0, 0], sizes = [1, 8, 24], strides = [1, 1, 1]} : vector<9x8x24xf32> to vector<1x8x24xf32>
      %42 = vector.shape_cast %41 : vector<1x8x24xf32> to vector<8x24xf32>
      %cst_12 = arith.constant dense<0.000000e+00> : vector<8x78xf32>
      %43 = tpu.matmul %42, %40, %cst_12 {dimension_numbers = #tpu.dot_dimension_numbers<[1], [0], [0], [1], [0, 0, 1, 1], [], []>} : vector<8x24xf32>, vector<24x78xf32>, vector<8x78xf32> -> vector<8x78xf32>
      %44 = arith.addf %39, %43 : vector<8x78xf32>
      %45 = vector.extract_strided_slice %12 {offsets = [0, 20], sizes = [24, 78], strides = [1, 1]} : vector<24x128xf32> to vector<24x78xf32>
      %46 = vector.extract_strided_slice %13 {offsets = [6, 0, 0], sizes = [1, 8, 24], strides = [1, 1, 1]} : vector<9x8x24xf32> to vector<1x8x24xf32>
      %47 = vector.shape_cast %46 : vector<1x8x24xf32> to vector<8x24xf32>
      %cst_13 = arith.constant dense<0.000000e+00> : vector<8x78xf32>
      %48 = tpu.matmul %47, %45, %cst_13 {dimension_numbers = #tpu.dot_dimension_numbers<[1], [0], [0], [1], [0, 0, 1, 1], [], []>} : vector<8x24xf32>, vector<24x78xf32>, vector<8x78xf32> -> vector<8x78xf32>
      %49 = arith.addf %44, %48 : vector<8x78xf32>
      %50 = vector.extract_strided_slice %12 {offsets = [0, 21], sizes = [24, 78], strides = [1, 1]} : vector<24x128xf32> to vector<24x78xf32>
      %51 = vector.extract_strided_slice %13 {offsets = [7, 0, 0], sizes = [1, 8, 24], strides = [1, 1, 1]} : vector<9x8x24xf32> to vector<1x8x24xf32>
      %52 = vector.shape_cast %51 : vector<1x8x24xf32> to vector<8x24xf32>
      %cst_14 = arith.constant dense<0.000000e+00> : vector<8x78xf32>
      %53 = tpu.matmul %52, %50, %cst_14 {dimension_numbers = #tpu.dot_dimension_numbers<[1], [0], [0], [1], [0, 0, 1, 1], [], []>} : vector<8x24xf32>, vector<24x78xf32>, vector<8x78xf32> -> vector<8x78xf32>
      %54 = arith.addf %49, %53 : vector<8x78xf32>
      %55 = vector.extract_strided_slice %12 {offsets = [0, 22], sizes = [24, 78], strides = [1, 1]} : vector<24x128xf32> to vector<24x78xf32>
      %56 = vector.extract_strided_slice %13 {offsets = [8, 0, 0], sizes = [1, 8, 24], strides = [1, 1, 1]} : vector<9x8x24xf32> to vector<1x8x24xf32>
      %57 = vector.shape_cast %56 : vector<1x8x24xf32> to vector<8x24xf32>
      %cst_15 = arith.constant dense<0.000000e+00> : vector<8x78xf32>
      %58 = tpu.matmul %57, %55, %cst_15 {dimension_numbers = #tpu.dot_dimension_numbers<[1], [0], [0], [1], [0, 0, 1, 1], [], []>} : vector<8x24xf32>, vector<24x78xf32>, vector<8x78xf32> -> vector<8x78xf32>
      %59 = arith.addf %54, %58 : vector<8x78xf32>
      %c0_16 = arith.constant 0 : index
      %c0_17 = arith.constant 0 : index
      %60 = vector.load %arg4[%c0_16, %c0_17] : memref<8x1xf32, #tpu.memory_space<vmem>>, vector<8x1xf32>
      %61 = vector.broadcast %60 : vector<8x1xf32> to vector<8x78xf32>
      %62 = arith.addf %59, %61 : vector<8x78xf32>
      %cst_18 = arith.constant 0.000000e+00 : f32
      %63 = vector.broadcast %cst_18 : f32 to vector<8x78xf32>
      %64 = arith.maximumf %62, %63 : vector<8x78xf32>
      %c0_19 = arith.constant 0 : index
      %c0_20 = arith.constant 0 : index
      %65 = vector.load %arg5[%c0_19, %c0_20] : memref<1x78xf32, #tpu.memory_space<vmem>>, vector<1x78xf32>
      %66 = vector.broadcast %65 : vector<1x78xf32> to vector<8x78xf32>
      %67 = arith.mulf %64, %66 : vector<8x78xf32>
      %cst_21 = arith.constant 0.000000e+00 : f32
      %68 = vector.broadcast %cst_21 : f32 to vector<8x11xf32>
      %cst_22 = arith.constant 0.000000e+00 : f32
      %69 = vector.broadcast %cst_22 : f32 to vector<8x39xf32>
      %70 = tpu.concatenate %68, %67, %69 in 1 : vector<8x11xf32>, vector<8x78xf32>, vector<8x39xf32> -> vector<8x128xf32>
      %c0_23 = arith.constant 0 : index
      %c0_24 = arith.constant 0 : index
      %c0_25 = arith.constant 0 : index
      %c0_26 = arith.constant 0 : index
      %71 = vector.load %arg6[%c0_23, %c0_24, %c0_25, %c0_26] : memref<1x1x8x128xf32, #tpu.memory_space<vmem>>, vector<1x1x8x128xf32>
      %72 = vector.shape_cast %71 : vector<1x1x8x128xf32> to vector<8x128xf32>
      %73 = vector.shape_cast %70 : vector<8x128xf32> to vector<1x1x8x128xf32>
      tpu.vector_store %arg6[%c0_23, %c0_24, %c0_25, %c0_26], %73 {strides = array<i32>} : memref<1x1x8x128xf32, #tpu.memory_space<vmem>>, vector<1x1x8x128xf32>,
    } else {
    }
    return
  }
  func.func @transform_0(%arg0: i32, %arg1: i32) -> (i32, i32, i32, i32) {
    %c0_i32 = arith.constant 0 : i32
    %c0_i32_0 = arith.constant 0 : i32
    %c0_i32_1 = arith.constant 0 : i32
    %c0_i32_2 = arith.constant 0 : i32
    return %arg0, %c0_i32, %c0_i32_0, %c0_i32_1 : i32, i32, i32, i32
  }
  func.func @transform_1(%arg0: i32, %arg1: i32) -> (i32, i32, i32) {
    %c0_i32 = arith.constant 0 : i32
    %c0_i32_0 = arith.constant 0 : i32
    %c0_i32_1 = arith.constant 0 : i32
    %c0_i32_2 = arith.constant 0 : i32
    return %c0_i32, %c0_i32_0, %c0_i32_1 : i32, i32, i32
  }
  func.func @transform_2(%arg0: i32, %arg1: i32) -> (i32, i32) {
    %c0_i32 = arith.constant 0 : i32
    %c0_i32_0 = arith.constant 0 : i32
    %c0_i32_1 = arith.constant 0 : i32
    return %c0_i32, %c0_i32_0 : i32, i32
  }
  func.func @transform_3(%arg0: i32, %arg1: i32) -> (i32, i32) {
    %c0_i32 = arith.constant 0 : i32
    %c0_i32_0 = arith.constant 0 : i32
    %c0_i32_1 = arith.constant 0 : i32
    return %c0_i32, %c0_i32_0 : i32, i32
  }
  func.func @transform_4(%arg0: i32, %arg1: i32) -> (i32, i32, i32, i32) {
    %c0_i32 = arith.constant 0 : i32
    %c0_i32_0 = arith.constant 0 : i32
    %c0_i32_1 = arith.constant 0 : i32
    return %arg0, %arg1, %c0_i32, %c0_i32_0 : i32, i32, i32, i32
  }
}

module attributes {stable_mosaic.version = 11 : i64} {
  func.func @kernel(%arg0: i32, %arg1: i32, %arg2: memref<1x10x8x128xf32, #tpu.memory_space<vmem>>, %arg3: memref<9x8x24xf32, #tpu.memory_space<vmem>>, %arg4: memref<8x1xf32, #tpu.memory_space<vmem>>, %arg5: memref<1x78xf32, #tpu.memory_space<vmem>>, %arg6: memref<1x1x8x128xf32, #tpu.memory_space<vmem>>, %arg7: memref<1x1x8x128xf32, #tpu.memory_space<vmem>>) attributes {dimension_semantics = [#tpu.dimension_semantics<parallel>, #tpu.dimension_semantics<parallel>], iteration_bounds = array<i64: 2, 10>, scalar_prefetch = 0 : i64, scratch_operands = 0 : i64, tpu.core_type = #tpu.core_type<tc>, window_params = [{transform_indices = @transform_0, window_bounds = array<i64: 1, 10, 8, 128>}, {pipeline_mode = #tpu.pipeline_mode<synchronous>, transform_indices = @transform_1, window_bounds = array<i64: 9, 8, 24>}, {pipeline_mode = #tpu.pipeline_mode<synchronous>, transform_indices = @transform_2, window_bounds = array<i64: 8, 1>}, {pipeline_mode = #tpu.pipeline_mode<synchronous>, transform_indices = @transform_3, window_bounds = array<i64: 1, 78>}, {transform_indices = @transform_4, window_bounds = array<i64: 1, 1, 8, 128>}, {transform_indices = @transform_5, window_bounds = array<i64: 1, 1, 8, 128>}]} {
    %c0_i32 = arith.constant 0 : i32
    %0 = arith.cmpi eq, %arg1, %c0_i32 : i32
    %c9_i32 = arith.constant 9 : i32
    %1 = arith.cmpi eq, %arg1, %c9_i32 : i32
    %2 = arith.ori %0, %1 : i1
    %3 = arith.extui %2 : i1 to i32
    %c0_i32_0 = arith.constant 0 : i32
    %4 = arith.cmpi ne, %3, %c0_i32_0 : i32
    scf.if %4 {
      %cst = arith.constant 0.000000e+00 : f32
      %8 = vector.broadcast %cst : f32 to vector<1x1x8x128xf32>
      %c0 = arith.constant 0 : index
      %c0_2 = arith.constant 0 : index
      %c0_3 = arith.constant 0 : index
      %c0_4 = arith.constant 0 : index
      %9 = vector.load %arg7[%c0, %c0_2, %c0_3, %c0_4] : memref<1x1x8x128xf32, #tpu.memory_space<vmem>>, vector<1x1x8x128xf32>
      tpu.vector_store %arg7[%c0, %c0_2, %c0_3, %c0_4], %8 {strides = array<i32>} : memref<1x1x8x128xf32, #tpu.memory_space<vmem>>, vector<1x1x8x128xf32>,
    } else {
    }
    %true = arith.constant true
    %5 = arith.xori %2, %true : i1
    %6 = arith.extui %5 : i1 to i32
    %c0_i32_1 = arith.constant 0 : i32
    %7 = arith.cmpi ne, %6, %c0_i32_1 : i32
    scf.if %7 {
      %c1_i32 = arith.constant 1 : i32
      %8 = arith.subi %arg1, %c1_i32 : i32
      %c0 = arith.constant 0 : index
      %9 = arith.index_cast %8 : i32 to index
      %c0_2 = arith.constant 0 : index
      %c0_3 = arith.constant 0 : index
      %10 = vector.load %arg2[%c0, %9, %c0_2, %c0_3] : memref<1x10x8x128xf32, #tpu.memory_space<vmem>>, vector<1x3x8x128xf32>
      %11 = vector.shape_cast %10 : vector<1x3x8x128xf32> to vector<3x8x128xf32>
      %12 = vector.shape_cast %11 : vector<3x8x128xf32> to vector<24x128xf32>
      %c0_4 = arith.constant 0 : index
      %c0_5 = arith.constant 0 : index
      %c0_6 = arith.constant 0 : index
      %13 = vector.load %arg3[%c0_4, %c0_5, %c0_6] : memref<9x8x24xf32, #tpu.memory_space<vmem>>, vector<9x8x24xf32>
      %cst = arith.constant 0.000000e+00 : f32
      %14 = vector.broadcast %cst : f32 to vector<8x78xf32>
      %15 = vector.extract_strided_slice %12 {offsets = [0, 0], sizes = [24, 78], strides = [1, 1]} : vector<24x128xf32> to vector<24x78xf32>
      %16 = vector.extract_strided_slice %13 {offsets = [0, 0, 0], sizes = [1, 8, 24], strides = [1, 1, 1]} : vector<9x8x24xf32> to vector<1x8x24xf32>
      %17 = vector.shape_cast %16 : vector<1x8x24xf32> to vector<8x24xf32>
      %cst_7 = arith.constant dense<0.000000e+00> : vector<8x78xf32>
      %18 = tpu.matmul %17, %15, %cst_7 {dimension_numbers = #tpu.dot_dimension_numbers<[1], [0], [0], [1], [0, 0, 1, 1], [], []>} : vector<8x24xf32>, vector<24x78xf32>, vector<8x78xf32> -> vector<8x78xf32>
      %19 = arith.addf %14, %18 : vector<8x78xf32>
      %20 = vector.extract_strided_slice %12 {offsets = [0, 1], sizes = [24, 78], strides = [1, 1]} : vector<24x128xf32> to vector<24x78xf32>
      %21 = vector.extract_strided_slice %13 {offsets = [1, 0, 0], sizes = [1, 8, 24], strides = [1, 1, 1]} : vector<9x8x24xf32> to vector<1x8x24xf32>
      %22 = vector.shape_cast %21 : vector<1x8x24xf32> to vector<8x24xf32>
      %cst_8 = arith.constant dense<0.000000e+00> : vector<8x78xf32>
      %23 = tpu.matmul %22, %20, %cst_8 {dimension_numbers = #tpu.dot_dimension_numbers<[1], [0], [0], [1], [0, 0, 1, 1], [], []>} : vector<8x24xf32>, vector<24x78xf32>, vector<8x78xf32> -> vector<8x78xf32>
      %24 = arith.addf %19, %23 : vector<8x78xf32>
      %25 = vector.extract_strided_slice %12 {offsets = [0, 2], sizes = [24, 78], strides = [1, 1]} : vector<24x128xf32> to vector<24x78xf32>
      %26 = vector.extract_strided_slice %13 {offsets = [2, 0, 0], sizes = [1, 8, 24], strides = [1, 1, 1]} : vector<9x8x24xf32> to vector<1x8x24xf32>
      %27 = vector.shape_cast %26 : vector<1x8x24xf32> to vector<8x24xf32>
      %cst_9 = arith.constant dense<0.000000e+00> : vector<8x78xf32>
      %28 = tpu.matmul %27, %25, %cst_9 {dimension_numbers = #tpu.dot_dimension_numbers<[1], [0], [0], [1], [0, 0, 1, 1], [], []>} : vector<8x24xf32>, vector<24x78xf32>, vector<8x78xf32> -> vector<8x78xf32>
      %29 = arith.addf %24, %28 : vector<8x78xf32>
      %30 = vector.extract_strided_slice %12 {offsets = [0, 10], sizes = [24, 78], strides = [1, 1]} : vector<24x128xf32> to vector<24x78xf32>
      %31 = vector.extract_strided_slice %13 {offsets = [3, 0, 0], sizes = [1, 8, 24], strides = [1, 1, 1]} : vector<9x8x24xf32> to vector<1x8x24xf32>
      %32 = vector.shape_cast %31 : vector<1x8x24xf32> to vector<8x24xf32>
      %cst_10 = arith.constant dense<0.000000e+00> : vector<8x78xf32>
      %33 = tpu.matmul %32, %30, %cst_10 {dimension_numbers = #tpu.dot_dimension_numbers<[1], [0], [0], [1], [0, 0, 1, 1], [], []>} : vector<8x24xf32>, vector<24x78xf32>, vector<8x78xf32> -> vector<8x78xf32>
      %34 = arith.addf %29, %33 : vector<8x78xf32>
      %35 = vector.extract_strided_slice %12 {offsets = [0, 11], sizes = [24, 78], strides = [1, 1]} : vector<24x128xf32> to vector<24x78xf32>
      %36 = vector.extract_strided_slice %13 {offsets = [4, 0, 0], sizes = [1, 8, 24], strides = [1, 1, 1]} : vector<9x8x24xf32> to vector<1x8x24xf32>
      %37 = vector.shape_cast %36 : vector<1x8x24xf32> to vector<8x24xf32>
      %cst_11 = arith.constant dense<0.000000e+00> : vector<8x78xf32>
      %38 = tpu.matmul %37, %35, %cst_11 {dimension_numbers = #tpu.dot_dimension_numbers<[1], [0], [0], [1], [0, 0, 1, 1], [], []>} : vector<8x24xf32>, vector<24x78xf32>, vector<8x78xf32> -> vector<8x78xf32>
      %39 = arith.addf %34, %38 : vector<8x78xf32>
      %40 = vector.extract_strided_slice %12 {offsets = [0, 12], sizes = [24, 78], strides = [1, 1]} : vector<24x128xf32> to vector<24x78xf32>
      %41 = vector.extract_strided_slice %13 {offsets = [5, 0, 0], sizes = [1, 8, 24], strides = [1, 1, 1]} : vector<9x8x24xf32> to vector<1x8x24xf32>
      %42 = vector.shape_cast %41 : vector<1x8x24xf32> to vector<8x24xf32>
      %cst_12 = arith.constant dense<0.000000e+00> : vector<8x78xf32>
      %43 = tpu.matmul %42, %40, %cst_12 {dimension_numbers = #tpu.dot_dimension_numbers<[1], [0], [0], [1], [0, 0, 1, 1], [], []>} : vector<8x24xf32>, vector<24x78xf32>, vector<8x78xf32> -> vector<8x78xf32>
      %44 = arith.addf %39, %43 : vector<8x78xf32>
      %45 = vector.extract_strided_slice %12 {offsets = [0, 20], sizes = [24, 78], strides = [1, 1]} : vector<24x128xf32> to vector<24x78xf32>
      %46 = vector.extract_strided_slice %13 {offsets = [6, 0, 0], sizes = [1, 8, 24], strides = [1, 1, 1]} : vector<9x8x24xf32> to vector<1x8x24xf32>
      %47 = vector.shape_cast %46 : vector<1x8x24xf32> to vector<8x24xf32>
      %cst_13 = arith.constant dense<0.000000e+00> : vector<8x78xf32>
      %48 = tpu.matmul %47, %45, %cst_13 {dimension_numbers = #tpu.dot_dimension_numbers<[1], [0], [0], [1], [0, 0, 1, 1], [], []>} : vector<8x24xf32>, vector<24x78xf32>, vector<8x78xf32> -> vector<8x78xf32>
      %49 = arith.addf %44, %48 : vector<8x78xf32>
      %50 = vector.extract_strided_slice %12 {offsets = [0, 21], sizes = [24, 78], strides = [1, 1]} : vector<24x128xf32> to vector<24x78xf32>
      %51 = vector.extract_strided_slice %13 {offsets = [7, 0, 0], sizes = [1, 8, 24], strides = [1, 1, 1]} : vector<9x8x24xf32> to vector<1x8x24xf32>
      %52 = vector.shape_cast %51 : vector<1x8x24xf32> to vector<8x24xf32>
      %cst_14 = arith.constant dense<0.000000e+00> : vector<8x78xf32>
      %53 = tpu.matmul %52, %50, %cst_14 {dimension_numbers = #tpu.dot_dimension_numbers<[1], [0], [0], [1], [0, 0, 1, 1], [], []>} : vector<8x24xf32>, vector<24x78xf32>, vector<8x78xf32> -> vector<8x78xf32>
      %54 = arith.addf %49, %53 : vector<8x78xf32>
      %55 = vector.extract_strided_slice %12 {offsets = [0, 22], sizes = [24, 78], strides = [1, 1]} : vector<24x128xf32> to vector<24x78xf32>
      %56 = vector.extract_strided_slice %13 {offsets = [8, 0, 0], sizes = [1, 8, 24], strides = [1, 1, 1]} : vector<9x8x24xf32> to vector<1x8x24xf32>
      %57 = vector.shape_cast %56 : vector<1x8x24xf32> to vector<8x24xf32>
      %cst_15 = arith.constant dense<0.000000e+00> : vector<8x78xf32>
      %58 = tpu.matmul %57, %55, %cst_15 {dimension_numbers = #tpu.dot_dimension_numbers<[1], [0], [0], [1], [0, 0, 1, 1], [], []>} : vector<8x24xf32>, vector<24x78xf32>, vector<8x78xf32> -> vector<8x78xf32>
      %59 = arith.addf %54, %58 : vector<8x78xf32>
      %c0_16 = arith.constant 0 : index
      %c0_17 = arith.constant 0 : index
      %60 = vector.load %arg4[%c0_16, %c0_17] : memref<8x1xf32, #tpu.memory_space<vmem>>, vector<8x1xf32>
      %61 = vector.broadcast %60 : vector<8x1xf32> to vector<8x78xf32>
      %62 = arith.addf %59, %61 : vector<8x78xf32>
      %cst_18 = arith.constant 0.000000e+00 : f32
      %63 = vector.broadcast %cst_18 : f32 to vector<8x78xf32>
      %64 = arith.maximumf %62, %63 : vector<8x78xf32>
      %c0_19 = arith.constant 0 : index
      %c0_20 = arith.constant 0 : index
      %65 = vector.load %arg5[%c0_19, %c0_20] : memref<1x78xf32, #tpu.memory_space<vmem>>, vector<1x78xf32>
      %66 = vector.broadcast %65 : vector<1x78xf32> to vector<8x78xf32>
      %67 = arith.mulf %64, %66 : vector<8x78xf32>
      %c0_21 = arith.constant 0 : index
      %c0_22 = arith.constant 0 : index
      %c0_23 = arith.constant 0 : index
      %c11 = arith.constant 11 : index
      %68 = vector.load %arg6[%c0_21, %c0_22, %c0_23, %c11] : memref<1x1x8x128xf32, #tpu.memory_space<vmem>>, vector<1x1x8x78xf32>
      %69 = vector.shape_cast %68 : vector<1x1x8x78xf32> to vector<8x78xf32>
      %70 = arith.addf %67, %69 : vector<8x78xf32>
      %cst_24 = arith.constant 0.000000e+00 : f32
      %71 = vector.broadcast %cst_24 : f32 to vector<8x11xf32>
      %cst_25 = arith.constant 0.000000e+00 : f32
      %72 = vector.broadcast %cst_25 : f32 to vector<8x39xf32>
      %73 = tpu.concatenate %71, %70, %72 in 1 : vector<8x11xf32>, vector<8x78xf32>, vector<8x39xf32> -> vector<8x128xf32>
      %c0_26 = arith.constant 0 : index
      %c0_27 = arith.constant 0 : index
      %c0_28 = arith.constant 0 : index
      %c0_29 = arith.constant 0 : index
      %74 = vector.load %arg7[%c0_26, %c0_27, %c0_28, %c0_29] : memref<1x1x8x128xf32, #tpu.memory_space<vmem>>, vector<1x1x8x128xf32>
      %75 = vector.shape_cast %74 : vector<1x1x8x128xf32> to vector<8x128xf32>
      %76 = vector.shape_cast %73 : vector<8x128xf32> to vector<1x1x8x128xf32>
      tpu.vector_store %arg7[%c0_26, %c0_27, %c0_28, %c0_29], %76 {strides = array<i32>} : memref<1x1x8x128xf32, #tpu.memory_space<vmem>>, vector<1x1x8x128xf32>,
    } else {
    }
    return
  }
  func.func @transform_0(%arg0: i32, %arg1: i32) -> (i32, i32, i32, i32) {
    %c0_i32 = arith.constant 0 : i32
    %c0_i32_0 = arith.constant 0 : i32
    %c0_i32_1 = arith.constant 0 : i32
    %c0_i32_2 = arith.constant 0 : i32
    return %arg0, %c0_i32, %c0_i32_0, %c0_i32_1 : i32, i32, i32, i32
  }
  func.func @transform_1(%arg0: i32, %arg1: i32) -> (i32, i32, i32) {
    %c0_i32 = arith.constant 0 : i32
    %c0_i32_0 = arith.constant 0 : i32
    %c0_i32_1 = arith.constant 0 : i32
    %c0_i32_2 = arith.constant 0 : i32
    return %c0_i32, %c0_i32_0, %c0_i32_1 : i32, i32, i32
  }
  func.func @transform_2(%arg0: i32, %arg1: i32) -> (i32, i32) {
    %c0_i32 = arith.constant 0 : i32
    %c0_i32_0 = arith.constant 0 : i32
    %c0_i32_1 = arith.constant 0 : i32
    return %c0_i32, %c0_i32_0 : i32, i32
  }
  func.func @transform_3(%arg0: i32, %arg1: i32) -> (i32, i32) {
    %c0_i32 = arith.constant 0 : i32
    %c0_i32_0 = arith.constant 0 : i32
    %c0_i32_1 = arith.constant 0 : i32
    return %c0_i32, %c0_i32_0 : i32, i32
  }
  func.func @transform_4(%arg0: i32, %arg1: i32) -> (i32, i32, i32, i32) {
    %c0_i32 = arith.constant 0 : i32
    %c0_i32_0 = arith.constant 0 : i32
    %c0_i32_1 = arith.constant 0 : i32
    return %arg0, %arg1, %c0_i32, %c0_i32_0 : i32, i32, i32, i32
  }
  func.func @transform_5(%arg0: i32, %arg1: i32) -> (i32, i32, i32, i32) {
    %c0_i32 = arith.constant 0 : i32
    %c0_i32_0 = arith.constant 0 : i32
    %c0_i32_1 = arith.constant 0 : i32
    return %arg0, %arg1, %c0_i32, %c0_i32_0 : i32, i32, i32, i32
  }
}

</mosaic_0001>

<bundles_post_ra>
// kernel: bridge_forward.4
= control target key start
LH: loop header
LB: loop body
LE: loop exit
PB: predicated region body
PF: predicated region fallthrough
CT: control target
= control target key end

     0   :  { %s829_s15 = smov 0   ;;  %s831_s16 = smov 0   ;;  %s933_s0 = inlined_call_operand.vmem [shape: f32[2,10,8,128], index: 0, kind: input, shape index: {}]   ;;  %s934_s1 = inlined_call_operand.vmem [shape: f32[9,8,24], index: 1, kind: input, shape index: {}]   ;;  %s935_s2 = inlined_call_operand.vmem [shape: f32[8,1], index: 2, kind: input, shape index: {}]   ;;  %s936_s3 = inlined_call_operand.vmem [shape: f32[1,78], index: 3, kind: input, shape index: {}]   ;;  %s937_s4 = inlined_call_operand.vmem [shape: f32[2,10,8,128], index: 4, kind: output, shape index: {}]  }
   0x1   :  { %s833_s17 = smov 0   ;;  %s835_s18 = smov 0  }
   0x2   :  { %s837_s19 = smov 0  }
   0x3 LB: > { %s23_s20 = sadd.s32 1, %s783_s17  ;;  %s26_s21 = sadd.s32 1, %s787_s18  ;;  %s791_s19 = sphi %s837_s19, %s14_s19   ;;  %s787_s18 = sphi %s835_s18, %s941_s18   ;;  %s783_s17 = sphi %s833_s17, %s940_s17   ;;  %s779_s16 = sphi %s831_s16, %s939_s16   ;;  %s775_s15 = sphi %s829_s15, %s938_s15  }
   0x4   : > { %p24_p0 = scmp.ge.s32.totalorder %s23_s20, 10  ;;  %p641_p1 = scmp.ge.s32.totalorder %s791_s19, 1 }
   0x5   : > { %p176_p2 = scmp.lt.s32.totalorder %s791_s19, 21 }
   0x6   : > { %s943_s20 = smov (%p24_p0, %s23_s20), 0  ;;  %s945_s21 = smov (!%p24_p0, %s26_s21), %s787_s18 }
   0x7   : > { %p177_p3 = pnand %p641_p1, %p176_p2  ;;  %p28_p4 = scmp.ge.s32.totalorder %s945_s21, 2 }
   0x8   : > { %p205_p5 = scmp.lt.s32.totalorder (!%p177_p3), %s779_s16, 1  ;;  %p212_p6 = scmp.lt.s32.totalorder (!%p177_p3), %s775_s15, 9 }
   0x9   : > { %s947_s21 = smov (%p28_p4, %s945_s21), 0  ;;  %180 = sbr.rel (%p177_p3) target bundleno = 415 (0x19f), region = 36 }
   0xa   : > { %p218_p7 = scmp.eq.s32.totalorder (!%p177_p3), %s775_s15, 0  ;;  %p219_p8 = scmp.eq.s32.totalorder (!%p177_p3), %s775_s15, 9 }
   0xc   : > { %p220_p9 = por (!%p177_p3), %p219_p8, %p218_p7 }
   0xe   : > { %s949_s16 = smov (!%p205_p5, %s779_s16), 1  ;;  %v793_v0 = vmov (%p220_p9), 0.0  }
   0xf   : > { %s213_s22 = scalar_select %p212_p6, %s775_s15, 9 }
  0x10   : > { %s657_s23 = smul.u32 80, %s949_s16 }
  0x11   : > { %s658_s24 = smul.u32 10, %s949_s16 }
  0x12   : > { %s209_s27 = scalar_lea.vmem %s933_s0, %s657_s23  ;;  %223 = sbr.rel (!%p220_p9) target bundleno = 23 (0x17), region = 40 }
  0x13   : > { %s215_s28 = sadd.s32 %s658_s24, %s213_s22 }
  0x14   : > { %s643_s29 = sshll.u32 %s215_s28, 3 }
  0x15   : > { %s871_s6 = scalar_lea.vmem %s937_s4, %s643_s29 }
  0x16   : > { %224 = vst [vmem:[%s871_s6] sm:$0xff] (%p220_p9), %v793_v0 }
  0x17 PF: > { %227 = sbr.rel (%p220_p9) target bundleno = 415 (0x19f), region = 44  ;;  %s644_s7 = sadd.s32 (!%p220_p9), 4294967295, %s775_s15 }
  0x18   : > { %s645_s8 = sshll.u32 (!%p220_p9), %s644_s7, 3  ;;  %s794_s10 = smov (!%p220_p9), 127  }
  0x19   : > { %s230_s9 = scalar_lea.vmem (!%p220_p9), %s209_s27, %s645_s8  ;;  %s795_s11 = smov (!%p220_p9), 118  }
  0x1a   : > { %s796_s12 = smov (!%p220_p9), 126   ;;  %s797_s13 = smov (!%p220_p9), 107  }
  0x1b   : > { %s798_s14 = smov (!%p220_p9), 108   ;;  %s799_s15 = smov (!%p220_p9), 117  }
  0x1c   : > { %v232_v1 = vld [vmem:[%s230_s9 + $0x8] sm:$0xff]  ;;  %v233_v2 = vld [vmem:[%s230_s9 + $0x10] sm:$0xff]  ;;  %v231_v3 = vld [vmem:[%s230_s9] sm:$0xff]  ;;  %s800_s16 = smov 116   ;;  %s801_s22 = smov 106   ;;  %vm255_vm0 = vcmask 195584  }
  0x1d   : > { %v720_v4 = vpack.i.bf16 %v232_v1, %v233_v2  ;;  %246 = vrot.lane.b32.xlu2 %v231_v3, %s794_s10  ;;  %295 = vmatpush.msra.mxu1 %v233_v2  ;;  %v234_v7 = vld [vmem:[%s934_s1] sm:$0xff]  ;;  %v237_v17 = vld [vmem:[%s934_s1 + $0x18] sm:$0xff]  ;;  %v236_v19 = vld [vmem:[%s934_s1 + $0x10] sm:$0xff]  ;;  %v802_v25 = vmov 0   ;;  %s803_s25 = smov 11   ;;  %vm550_vm1 = vcmask 89088  }
  0x1e   : > { %v533_v23 = vld [vmem:[%s935_s2] sm:$0xff]  ;;  %750 = vset.pattern.permute.xlu1 %v802_v25  ;;  %751 = vset.pattern.permute.xlu0 %v802_v25  ;;  %v235_v26 = vld [vmem:[%s934_s1 + $0x8] sm:$0xff]  ;;  %v240_v37 = vld [vmem:[%s934_s1 + $0x30] sm:$0xff]  ;;  %vm552_vm2 = vcmask 728064  }
  0x1f   : > { %721 = vrot.lane.b32.xlu1 %v720_v4, %s795_s11  ;;  %711 = vrot.lane.b32.xlu0 %v720_v4, %s796_s12  ;;  %v238_v35 = vld [vmem:[%s934_s1 + $0x20] sm:$0xff]  ;;  %v241_v42 = vld [vmem:[%s934_s1 + $0x38] sm:$0xff] }
  0x20   : > { %296 = vmatpush.msra.mxu1 %v232_v1  ;;  %v239_v43 = vld [vmem:[%s934_s1 + $0x28] sm:$0xff]  ;;  %v242_v46 = vld [vmem:[%s934_s1 + $0x40] sm:$0xff] }
  0x21   : > { %v752_v2 = vld [vmem:[%s936_s3] ss:$0 sm:$0xff] }
  0x22   : > { %297 = vmatpush.msra.mxu1 %v231_v3 }
  0x23   : > { %647 = vmatmul.msk.f32.vlgmr.msra.gmra.mxu1 %vm255_vm0, %v234_v7 }
  0x25   : > { %335 = vrot.lane.b32.xlu2 %v231_v3, %s795_s11 }
  0x27   : > { %716 = vrot.lane.b32.xlu0 %v720_v4, %s794_s10  ;;  %302 = vrot.lane.b32.xlu1 %v231_v3, %s796_s12 }
  0x2d   : > { %736 = vrot.lane.b32.xlu2 %v720_v4, %s797_s13 }
  0x2f   : > { %726 = vrot.lane.b32.xlu0 %v720_v4, %s798_s14  ;;  %731 = vrot.lane.b32.xlu1 %v720_v4, %s799_s15 }
  0x35   : > { %368 = vrot.lane.b32.xlu2 %v231_v3, %s799_s15 }
  0x37   : > { %741 = vrot.lane.b32.xlu0 %v720_v4, %s800_s16  ;;  %434 = vrot.lane.b32.xlu1 %v231_v3, %s798_s14 }
  0x3d   : > { %746 = vrot.lane.b32.xlu2 %v720_v4, %s801_s22 }
  0x3f   : > { %467 = vrot.lane.b32.xlu0 %v231_v3, %s797_s13  ;;  %401 = vrot.lane.b32.xlu1 %v231_v3, %s800_s16 }
  0x47   : > { %500 = vrot.lane.b32.xlu0 %v231_v3, %s801_s22  ;;  %536 = vperm.xlu1 %750, %v533_v23  }
  0x77   : > { %v247_v5 = vpop.permute.xlu2 %246 }
  0x7f   : > { %v336_v6 = vpop.permute.xlu2 %335 }
  0x87   : > { %v737_v8 = vpop.permute.xlu2 %736 }
  0x88   : > { %v738_v15 = vunpack.i.l.bf16 %v737_v8  ;;  %v739_v16 = vunpack.i.h.bf16 %v737_v8 }
  0x8f   : > { %v369_v18 = vpop.permute.xlu2 %368 }
  0x91   : > { %v722_v9 = vpop.permute.xlu1 %721  ;;  %v712_v10 = vpop.permute.xlu0 %711 }
  0x92   : > { %v713_v11 = vunpack.i.l.bf16 %v712_v10  ;;  %v723_v12 = vunpack.i.l.bf16 %v722_v9  ;;  %v724_v13 = vunpack.i.h.bf16 %v722_v9  ;;  %v714_v14 = vunpack.i.h.bf16 %v712_v10 }
  0x94   : > { %327 = vmatpush.msra.mxu2 %v713_v11  ;;  %360 = vmatpush.msra.mxu3 %v723_v12 }
  0x96   : > { %328 = vmatpush.msra.mxu2 %v714_v14  ;;  %361 = vmatpush.msra.mxu3 %v724_v13 }
  0x97   : > { %v747_v32 = vpop.permute.xlu2 %746 }
  0x98   : > { %362 = vmatpush.msra.mxu3 %v336_v6  ;;  %v748_v34 = vunpack.i.l.bf16 %v747_v32  ;;  %v749_v36 = vunpack.i.h.bf16 %v747_v32 }
  0x99   : > { %v717_v20 = vpop.permute.xlu0 %716  ;;  %v303_v21 = vpop.permute.xlu1 %302  ;;  %649 = vmatmul.msk.f32.vlgmr.msra.gmra.mxu3 %vm255_vm0, %v237_v17 }
  0x9a   : > { %492 = vmatpush.msrb.mxu3 %v738_v15  ;;  %v718_v22 = vunpack.i.l.bf16 %v717_v20  ;;  %329 = vmatpush.msra.mxu2 %v303_v21  ;;  %v719_v24 = vunpack.i.h.bf16 %v717_v20 }
  0x9b   : > { %648 = vmatmul.msk.f32.vlgmr.msra.gmra.mxu2 %vm255_vm0, %v236_v19 }
  0x9c   : > { %493 = vmatpush.msrb.mxu3 %v739_v16  ;;  %272 = vmatpush.msra.mxu0 %v718_v22 }
  0x9e   : > { %273 = vmatpush.msra.mxu0 %v719_v24 }
  0xa0   : > { %274 = vmatpush.msra.mxu0 %v247_v5  ;;  %v299_v48 = vpop.f32.mrf.mxu1 }
  0xa1   : > { %v727_v27 = vpop.permute.xlu0 %726  ;;  %v732_v28 = vpop.permute.xlu1 %731  ;;  %646 = vmatmul.msk.f32.vlgmr.msra.gmra.mxu0 %vm255_vm0, %v235_v26 }
  0xa2   : > { %v733_v29 = vunpack.i.l.bf16 %v732_v28  ;;  %v728_v30 = vunpack.i.l.bf16 %v727_v27  ;;  %v734_v31 = vunpack.i.h.bf16 %v732_v28  ;;  %v729_v33 = vunpack.i.h.bf16 %v727_v27 }
  0xa4   : > { %393 = vmatpush.msrb.mxu0 %v733_v29  ;;  %459 = vmatpush.msrb.mxu2 %v728_v30 }
  0xa6   : > { %394 = vmatpush.msrb.mxu0 %v734_v31  ;;  %460 = vmatpush.msrb.mxu2 %v729_v33 }
  0xa8   : > { %395 = vmatpush.msrb.mxu0 %v369_v18 }
  0xa9   : > { %v742_v38 = vpop.permute.xlu0 %741  ;;  %v435_v39 = vpop.permute.xlu1 %434  ;;  %650 = vmatmul.msk.f32.vlgmr.msrb.gmra.mxu0 %vm255_vm0, %v238_v35 }
  0xaa   : > { %v743_v40 = vunpack.i.l.bf16 %v742_v38  ;;  %461 = vmatpush.msrb.mxu2 %v435_v39  ;;  %525 = vmatpush.msra.mxu0 %v748_v34  ;;  %v744_v41 = vunpack.i.h.bf16 %v742_v38 }
  0xab   : > { %652 = vmatmul.msk.f32.vlgmr.msrb.gmra.mxu2 %vm255_vm0, %v240_v37 }
  0xac   : > { %426 = vmatpush.msrb.mxu1 %v743_v40  ;;  %526 = vmatpush.msra.mxu0 %v749_v36 }
  0xae   : > { %427 = vmatpush.msrb.mxu1 %v744_v41 }
  0xb1   : > { %v468_v44 = vpop.permute.xlu0 %467  ;;  %v402_v45 = vpop.permute.xlu1 %401 }
  0xb2   : > { %494 = vmatpush.msrb.mxu3 %v468_v44  ;;  %428 = vmatpush.msrb.mxu1 %v402_v45 }
  0xb3   : > { %653 = vmatmul.msk.f32.vlgmr.msrb.gmra.mxu3 %vm255_vm0, %v241_v42  ;;  %651 = vmatmul.msk.f32.vlgmr.msrb.gmra.mxu1 %vm255_vm0, %v239_v43 }
  0xb9   : > { %v501_v47 = vpop.permute.xlu0 %500  ;;  %v537_v0 = vpop.permute.xlu1 %536 }
  0xba   : > { %527 = vmatpush.msra.mxu0 %v501_v47 }
  0xbb   : > { %654 = vmatmul.msk.f32.vlgmr.msra.gmra.mxu0 %vm255_vm0, %v242_v46 }
 0x11c   : > { %v364_v53 = vpop.f32.mrf.mxu3 }
 0x11e   : > { %v276_v49 = vpop.f32.mrf.mxu0  ;;  %v331_v51 = vpop.f32.mrf.mxu2 }
 0x11f   : > { %v300_v50 = vadd.f32 %v299_v48, %v276_v49 }
 0x121   : > { %v334_v52 = vadd.f32 %v331_v51, %v300_v50 }
 0x123   : > { %v367_v54 = vadd.f32 %v364_v53, %v334_v52 }
 0x126   : > { %v397_v55 = vpop.f32.mrf.mxu0 }
 0x127   : > { %v400_v56 = vadd.f32 %v397_v55, %v367_v54 }
 0x12e   : > { %v463_v59 = vpop.f32.mrf.mxu2 }
 0x130   : > { %v430_v57 = vpop.f32.mrf.mxu1 }
 0x131   : > { %v433_v58 = vadd.f32 %v430_v57, %v400_v56 }
 0x133   : > { %v466_v60 = vadd.f32 %v463_v59, %v433_v58 }
 0x136   : > { %v496_v61 = vpop.f32.mrf.mxu3 }
 0x137   : > { %v499_v62 = vadd.f32 %v496_v61, %v466_v60 }
 0x138   : > { %v529_v63 = vpop.f32.mrf.mxu0 }
 0x139   : > { %v532_v1 = vadd.f32 %v529_v63, %v499_v62 }
 0x13b   : > { %v539_v3 = vadd.f32 %v537_v0, %v532_v1 }
 0x13d   : > { %v540_v4 = vmax.f32 %v539_v3, 0.0 }
 0x13f   : > { %v545_v5 = vmul.f32 %v752_v2, %v540_v4 }
 0x141   : > { %547 = vrot.lane.b32.xlu2 %v545_v5, %s803_s25 }
 0x19b   : > { %v548_v6 = vpop.permute.xlu2 %547 }
 0x19c   : > { %v551_v7 = vsel %vm550_vm1, 0.0, %v548_v6 }
 0x19d   : > { %v553_v8 = vsel %vm552_vm2, %v551_v7, 0.0 }
 0x19e   : > { %554 = vst [vmem:[%s871_s6] sm:$0xff] %v553_v8 }
 0x19f PF: > { %s14_s19 = sadd.s32 1, %s791_s19   ;;  %s938_s15 = smov %s783_s17 }
 0x1a0   : > { %p11_p10 = scmp.ge.s32.totalorder %s14_s19, 22   ;;  %s939_s16 = smov %s787_s18 }
 0x1a1   : > { %s940_s17 = smov %s943_s20  ;;  %s941_s18 = smov %s947_s21 }
 0x1a2   :  { %13 = sbr.rel (!%p11_p10) target bundleno = 3 (0x3), region = 75 }

// kernel: bridge_forward.5
= control target key start
LH: loop header
LB: loop body
LE: loop exit
PB: predicated region body
PF: predicated region fallthrough
CT: control target
= control target key end

     0   :  { %s917_s18 = smov 0   ;;  %s919_s19 = smov 0   ;;  %s1030_s0 = inlined_call_operand.vmem [shape: f32[2,10,8,128], index: 0, kind: input, shape index: {}]   ;;  %s1031_s1 = inlined_call_operand.vmem [shape: f32[9,8,24], index: 1, kind: input, shape index: {}]   ;;  %s1032_s2 = inlined_call_operand.vmem [shape: f32[8,1], index: 2, kind: input, shape index: {}]   ;;  %s1033_s3 = inlined_call_operand.vmem [shape: f32[1,78], index: 3, kind: input, shape index: {}]   ;;  %s1034_s4 = inlined_call_operand.vmem [shape: f32[2,10,8,128], index: 4, kind: input, shape index: {}]   ;;  %s1035_s5 = inlined_call_operand.vmem [shape: f32[2,10,8,128], index: 5, kind: output, shape index: {}]  }
   0x1   :  { %s921_s20 = smov 0   ;;  %s923_s21 = smov 0  }
   0x2   :  { %s925_s22 = smov 0  }
   0x3 LB: > { %s24_s23 = sadd.s32 1, %s866_s20  ;;  %s27_s24 = sadd.s32 1, %s870_s21  ;;  %s874_s22 = sphi %s925_s22, %s15_s22   ;;  %s870_s21 = sphi %s923_s21, %s1039_s21   ;;  %s866_s20 = sphi %s921_s20, %s1038_s20   ;;  %s862_s19 = sphi %s919_s19, %s1037_s19   ;;  %s858_s18 = sphi %s917_s18, %s1036_s18  }
   0x4   : > { %p25_p0 = scmp.ge.s32.totalorder %s24_s23, 10  ;;  %p723_p1 = scmp.ge.s32.totalorder %s874_s22, 1 }
   0x5   : > { %p216_p2 = scmp.lt.s32.totalorder %s874_s22, 21 }
   0x6   : > { %s1041_s23 = smov (%p25_p0, %s24_s23), 0  ;;  %s1043_s24 = smov (!%p25_p0, %s27_s24), %s870_s21 }
   0x7   : > { %p217_p3 = pnand %p723_p1, %p216_p2  ;;  %p29_p4 = scmp.ge.s32.totalorder %s1043_s24, 2 }
   0x8   : > { %p255_p5 = scmp.lt.s32.totalorder (!%p217_p3), %s862_s19, 1  ;;  %p262_p6 = scmp.lt.s32.totalorder (!%p217_p3), %s858_s18, 9 }
   0x9   : > { %s1045_s24 = smov (%p29_p4, %s1043_s24), 0  ;;  %220 = sbr.rel (%p217_p3) target bundleno = 441 (0x1b9), region = 40 }
   0xa   : > { %p276_p7 = scmp.eq.s32.totalorder (!%p217_p3), %s858_s18, 0  ;;  %p277_p8 = scmp.eq.s32.totalorder (!%p217_p3), %s858_s18, 9 }
   0xc   : > { %p278_p9 = por (!%p217_p3), %p277_p8, %p276_p7 }
   0xe   : > { %s1047_s19 = smov (!%p255_p5, %s862_s19), 1  ;;  %v876_v0 = vmov (%p278_p9), 0.0  }
   0xf   : > { %s263_s25 = scalar_select %p262_p6, %s858_s18, 9 }
  0x10   : > { %s740_s26 = smul.u32 80, %s1047_s19 }
  0x11   : > { %s741_s27 = smul.u32 10, %s1047_s19 }
  0x12   : > { %s259_s30 = scalar_lea.vmem %s1030_s0, %s740_s26  ;;  %281 = sbr.rel (!%p278_p9) target bundleno = 23 (0x17), region = 44 }
  0x13   : > { %s265_s6 = sadd.s32 %s741_s27, %s263_s25 }
  0x14   : > { %s725_s7 = sshll.u32 %s265_s6, 3 }
  0x15   : > { %s959_s10 = scalar_lea.vmem %s1034_s4, %s725_s7  ;;  %s964_s13 = scalar_lea.vmem %s1035_s5, %s725_s7 }
  0x16   : > { %282 = vst [vmem:[%s964_s13] sm:$0xff] (%p278_p9), %v876_v0 }
  0x17 PF: > { %285 = sbr.rel (%p278_p9) target bundleno = 441 (0x1b9), region = 48  ;;  %s727_s14 = sadd.s32 (!%p278_p9), 4294967295, %s858_s18 }
  0x18   : > { %s728_s15 = sshll.u32 (!%p278_p9), %s727_s14, 3  ;;  %s877_s17 = smov (!%p278_p9), 127  }
  0x19   : > { %s288_s16 = scalar_lea.vmem (!%p278_p9), %s259_s30, %s728_s15  ;;  %s878_s19 = smov (!%p278_p9), 118  }
  0x1a   : > { %s879_s25 = smov (!%p278_p9), 126   ;;  %s880_s26 = smov (!%p278_p9), 107  }
  0x1b   : > { %s881_s18 = smov (!%p278_p9), 108   ;;  %s882_s27 = smov (!%p278_p9), 117  }
  0x1c   : > { %v290_v1 = vld [vmem:[%s288_s16 + $0x8] sm:$0xff]  ;;  %v291_v2 = vld [vmem:[%s288_s16 + $0x10] sm:$0xff]  ;;  %v289_v3 = vld [vmem:[%s288_s16] sm:$0xff]  ;;  %s883_s28 = smov 116   ;;  %s884_s29 = smov 106   ;;  %vm313_vm0 = vcmask 195584  }
  0x1d   : > { %v803_v4 = vpack.i.bf16 %v290_v1, %v291_v2  ;;  %304 = vrot.lane.b32.xlu2 %v289_v3, %s877_s17  ;;  %353 = vmatpush.msra.mxu1 %v291_v2  ;;  %v292_v7 = vld [vmem:[%s1031_s1] sm:$0xff]  ;;  %v295_v17 = vld [vmem:[%s1031_s1 + $0x18] sm:$0xff]  ;;  %v294_v19 = vld [vmem:[%s1031_s1 + $0x10] sm:$0xff]  ;;  %v885_v26 = vmov 0   ;;  %s886_s8 = smov 11   ;;  %vm614_vm1 = vcmask 89088  }
  0x1e   : > { %v591_v23 = vld [vmem:[%s1032_s2] sm:$0xff]  ;;  %833 = vset.pattern.permute.xlu1 %v885_v26  ;;  %v293_v27 = vld [vmem:[%s1031_s1 + $0x8] sm:$0xff]  ;;  %834 = vset.pattern.permute.xlu0 %v885_v26  ;;  %v298_v38 = vld [vmem:[%s1031_s1 + $0x30] sm:$0xff]  ;;  %vm616_vm2 = vcmask 728064  }
  0x1f   : > { %804 = vrot.lane.b32.xlu1 %v803_v4, %s878_s19  ;;  %794 = vrot.lane.b32.xlu0 %v803_v4, %s879_s25  ;;  %v604_v24 = vld [vmem:[%s959_s10] sm:$0xff]  ;;  %v299_v43 = vld [vmem:[%s1031_s1 + $0x38] sm:$0xff] }
  0x20   : > { %354 = vmatpush.msra.mxu1 %v290_v1  ;;  %v296_v36 = vld [vmem:[%s1031_s1 + $0x20] sm:$0xff]  ;;  %v297_v44 = vld [vmem:[%s1031_s1 + $0x28] sm:$0xff] }
  0x21   : > { %v300_v47 = vld [vmem:[%s1031_s1 + $0x40] sm:$0xff] }
  0x22   : > { %355 = vmatpush.msra.mxu1 %v289_v3 }
  0x23   : > { %730 = vmatmul.msk.f32.vlgmr.msra.gmra.mxu1 %vm313_vm0, %v292_v7 }
  0x25   : > { %393 = vrot.lane.b32.xlu2 %v289_v3, %s878_s19 }
  0x27   : > { %799 = vrot.lane.b32.xlu0 %v803_v4, %s877_s17  ;;  %360 = vrot.lane.b32.xlu1 %v289_v3, %s879_s25 }
  0x2d   : > { %819 = vrot.lane.b32.xlu2 %v803_v4, %s880_s26 }
  0x2f   : > { %809 = vrot.lane.b32.xlu0 %v803_v4, %s881_s18  ;;  %814 = vrot.lane.b32.xlu1 %v803_v4, %s882_s27 }
  0x35   : > { %426 = vrot.lane.b32.xlu2 %v289_v3, %s882_s27 }
  0x37   : > { %824 = vrot.lane.b32.xlu0 %v803_v4, %s883_s28  ;;  %492 = vrot.lane.b32.xlu1 %v289_v3, %s881_s18 }
  0x3d   : > { %829 = vrot.lane.b32.xlu2 %v803_v4, %s884_s29  ;;  %v835_v4 = vld [vmem:[%s1033_s3] ss:$0 sm:$0xff] }
  0x3f   : > { %525 = vrot.lane.b32.xlu0 %v289_v3, %s880_s26  ;;  %459 = vrot.lane.b32.xlu1 %v289_v3, %s883_s28 }
  0x45   : > { %606 = vrot.lane.b32.xlu2 %v604_v24, %s882_s27 }
  0x47   : > { %558 = vrot.lane.b32.xlu0 %v289_v3, %s884_s29  ;;  %594 = vperm.xlu1 %833, %v591_v23  }
  0x77   : > { %v305_v5 = vpop.permute.xlu2 %304 }
  0x7f   : > { %v394_v6 = vpop.permute.xlu2 %393 }
  0x87   : > { %v820_v8 = vpop.permute.xlu2 %819 }
  0x88   : > { %v821_v15 = vunpack.i.l.bf16 %v820_v8  ;;  %v822_v16 = vunpack.i.h.bf16 %v820_v8 }
  0x8f   : > { %v427_v18 = vpop.permute.xlu2 %426 }
  0x91   : > { %v805_v9 = vpop.permute.xlu1 %804  ;;  %v795_v10 = vpop.permute.xlu0 %794 }
  0x92   : > { %v796_v11 = vunpack.i.l.bf16 %v795_v10  ;;  %v806_v12 = vunpack.i.l.bf16 %v805_v9  ;;  %v807_v13 = vunpack.i.h.bf16 %v805_v9  ;;  %v797_v14 = vunpack.i.h.bf16 %v795_v10 }
  0x94   : > { %385 = vmatpush.msra.mxu2 %v796_v11  ;;  %418 = vmatpush.msra.mxu3 %v806_v12 }
  0x96   : > { %386 = vmatpush.msra.mxu2 %v797_v14  ;;  %419 = vmatpush.msra.mxu3 %v807_v13 }
  0x97   : > { %v830_v33 = vpop.permute.xlu2 %829 }
  0x98   : > { %420 = vmatpush.msra.mxu3 %v394_v6  ;;  %v831_v35 = vunpack.i.l.bf16 %v830_v33  ;;  %v832_v37 = vunpack.i.h.bf16 %v830_v33 }
  0x99   : > { %v800_v20 = vpop.permute.xlu0 %799  ;;  %v361_v21 = vpop.permute.xlu1 %360  ;;  %732 = vmatmul.msk.f32.vlgmr.msra.gmra.mxu3 %vm313_vm0, %v295_v17 }
  0x9a   : > { %550 = vmatpush.msrb.mxu3 %v821_v15  ;;  %v801_v22 = vunpack.i.l.bf16 %v800_v20  ;;  %387 = vmatpush.msra.mxu2 %v361_v21  ;;  %v802_v25 = vunpack.i.h.bf16 %v800_v20 }
  0x9b   : > { %731 = vmatmul.msk.f32.vlgmr.msra.gmra.mxu2 %vm313_vm0, %v294_v19 }
  0x9c   : > { %551 = vmatpush.msrb.mxu3 %v822_v16  ;;  %330 = vmatpush.msra.mxu0 %v801_v22 }
  0x9e   : > { %331 = vmatpush.msra.mxu0 %v802_v25 }
  0x9f   : > { %v607_v6 = vpop.permute.xlu2 %606 }
  0xa0   : > { %332 = vmatpush.msra.mxu0 %v305_v5  ;;  %v357_v49 = vpop.f32.mrf.mxu1 }
  0xa1   : > { %v810_v28 = vpop.permute.xlu0 %809  ;;  %v815_v29 = vpop.permute.xlu1 %814  ;;  %729 = vmatmul.msk.f32.vlgmr.msra.gmra.mxu0 %vm313_vm0, %v293_v27 }
  0xa2   : > { %v816_v30 = vunpack.i.l.bf16 %v815_v29  ;;  %v811_v31 = vunpack.i.l.bf16 %v810_v28  ;;  %v817_v32 = vunpack.i.h.bf16 %v815_v29  ;;  %v812_v34 = vunpack.i.h.bf16 %v810_v28 }
  0xa4   : > { %451 = vmatpush.msrb.mxu0 %v816_v30  ;;  %517 = vmatpush.msrb.mxu2 %v811_v31 }
  0xa6   : > { %452 = vmatpush.msrb.mxu0 %v817_v32  ;;  %518 = vmatpush.msrb.mxu2 %v812_v34 }
  0xa8   : > { %453 = vmatpush.msrb.mxu0 %v427_v18 }
  0xa9   : > { %v825_v39 = vpop.permute.xlu0 %824  ;;  %v493_v40 = vpop.permute.xlu1 %492  ;;  %733 = vmatmul.msk.f32.vlgmr.msrb.gmra.mxu0 %vm313_vm0, %v296_v36 }
  0xaa   : > { %v826_v41 = vunpack.i.l.bf16 %v825_v39  ;;  %519 = vmatpush.msrb.mxu2 %v493_v40  ;;  %583 = vmatpush.msra.mxu0 %v831_v35  ;;  %v827_v42 = vunpack.i.h.bf16 %v825_v39 }
  0xab   : > { %735 = vmatmul.msk.f32.vlgmr.msrb.gmra.mxu2 %vm313_vm0, %v298_v38 }
  0xac   : > { %484 = vmatpush.msrb.mxu1 %v826_v41  ;;  %584 = vmatpush.msra.mxu0 %v832_v37 }
  0xae   : > { %485 = vmatpush.msrb.mxu1 %v827_v42 }
  0xb1   : > { %v526_v45 = vpop.permute.xlu0 %525  ;;  %v460_v46 = vpop.permute.xlu1 %459 }
  0xb2   : > { %552 = vmatpush.msrb.mxu3 %v526_v45  ;;  %486 = vmatpush.msrb.mxu1 %v460_v46 }
  0xb3   : > { %736 = vmatmul.msk.f32.vlgmr.msrb.gmra.mxu3 %vm313_vm0, %v299_v43  ;;  %734 = vmatmul.msk.f32.vlgmr.msrb.gmra.mxu1 %vm313_vm0, %v297_v44 }
  0xb9   : > { %v559_v48 = vpop.permute.xlu0 %558  ;;  %v595_v1 = vpop.permute.xlu1 %594 }
  0xba   : > { %585 = vmatpush.msra.mxu0 %v559_v48 }
  0xbb   : > { %737 = vmatmul.msk.f32.vlgmr.msra.gmra.mxu0 %vm313_vm0, %v300_v47 }
 0x11c   : > { %v422_v54 = vpop.f32.mrf.mxu3 }
 0x11e   : > { %v334_v50 = vpop.f32.mrf.mxu0  ;;  %v389_v52 = vpop.f32.mrf.mxu2 }
 0x11f   : > { %v358_v51 = vadd.f32 %v357_v49, %v334_v50 }
 0x121   : > { %v392_v53 = vadd.f32 %v389_v52, %v358_v51 }
 0x123   : > { %v425_v55 = vadd.f32 %v422_v54, %v392_v53 }
 0x126   : > { %v455_v56 = vpop.f32.mrf.mxu0 }
 0x127   : > { %v458_v57 = vadd.f32 %v455_v56, %v425_v55 }
 0x12e   : > { %v521_v60 = vpop.f32.mrf.mxu2 }
 0x130   : > { %v488_v58 = vpop.f32.mrf.mxu1 }
 0x131   : > { %v491_v59 = vadd.f32 %v488_v58, %v458_v57 }
 0x133   : > { %v524_v61 = vadd.f32 %v521_v60, %v491_v59 }
 0x136   : > { %v554_v62 = vpop.f32.mrf.mxu3 }
 0x137   : > { %v557_v63 = vadd.f32 %v554_v62, %v524_v61 }
 0x138   : > { %v587_v0 = vpop.f32.mrf.mxu0 }
 0x139   : > { %v590_v2 = vadd.f32 %v587_v0, %v557_v63 }
 0x13b   : > { %v597_v3 = vadd.f32 %v595_v1, %v590_v2 }
 0x13d   : > { %v598_v5 = vmax.f32 %v597_v3, 0.0 }
 0x13f   : > { %v603_v7 = vmul.f32 %v835_v4, %v598_v5 }
 0x141   : > { %v609_v8 = vadd.f32 %v607_v6, %v603_v7 }
 0x143   : > { %611 = vrot.lane.b32.xlu0 %v609_v8, %s886_s8 }
 0x1b5   : > { %v612_v9 = vpop.permute.xlu0 %611 }
 0x1b6   : > { %v615_v10 = vsel %vm614_vm1, 0.0, %v612_v9 }
 0x1b7   : > { %v617_v11 = vsel %vm616_vm2, %v615_v10, 0.0 }
 0x1b8   : > { %618 = vst [vmem:[%s964_s13] sm:$0xff] %v617_v11 }
 0x1b9 PF: > { %s15_s22 = sadd.s32 1, %s874_s22   ;;  %s1036_s18 = smov %s866_s20 }
 0x1ba   : > { %p12_p10 = scmp.ge.s32.totalorder %s15_s22, 22   ;;  %s1037_s19 = smov %s870_s21 }
 0x1bb   : > { %s1038_s20 = smov %s1041_s23  ;;  %s1039_s21 = smov %s1045_s24 }
 0x1bc   :  { %14 = sbr.rel (!%p12_p10) target bundleno = 3 (0x3), region = 82 }

</bundles_post_ra>
